<compile_context>
chip_gen: v7x
topology: tpu7x:2x2x1
jax: 0.10.0
libtpu: 0.0.40
codegen_flags: <defaults>
</compile_context>

<pallas_src>
import numpy as np

import jax
import jax.numpy as jnp
from jax.experimental import pallas as pl
from jax.experimental.pallas import tpu as pltpu

EPS = 1e-5
VMEM_LIMIT = 32 * 1024 * 1024


def _round_up(x, m):
    return (x + m - 1) // m * m


# ---------------------------------------------------------------------------
# Kernel 1: fused sparse conv (single [nt, K*Cin] x [K*Cin, Cout] bf16 matmul)
#           + per-tile per-channel sum / sum-of-squares partials for BN.
# ---------------------------------------------------------------------------
def conv_stats_kernel(xg_ref, w_ref, y_ref, stats_ref):
    y = jnp.dot(xg_ref[...], w_ref[...], preferred_element_type=jnp.float32)
    y_ref[...] = y.astype(y_ref.dtype)                     # bf16 writeback
    stats_ref[...] = jnp.zeros_like(stats_ref)             # 8-sublane padded
    stats_ref[0:1, :] = jnp.sum(y, axis=0, keepdims=True)
    stats_ref[1:2, :] = jnp.sum(y * y, axis=0, keepdims=True)


# ---------------------------------------------------------------------------
# Kernel 2: second sparse conv + downsample 1x1 conv (both bf16 MXU) + per-tile
#           BN partials for both branches.
# ---------------------------------------------------------------------------
def conv_ds_stats_kernel(yg_ref, w2_ref, x_ref, wd_ref, y2_ref, d_ref, stats_ref):
    y2 = jnp.dot(yg_ref[...], w2_ref[...], preferred_element_type=jnp.float32)
    # Conv3d(kernel_size=1, stride=1) on a sparse tensor == per-point linear.
    d = jnp.dot(x_ref[...], wd_ref[...], preferred_element_type=jnp.float32)
    y2_ref[...] = y2.astype(y2_ref.dtype)
    d_ref[...] = d.astype(d_ref.dtype)
    stats_ref[...] = jnp.zeros_like(stats_ref)
    stats_ref[0:1, :] = jnp.sum(y2, axis=0, keepdims=True)
    stats_ref[1:2, :] = jnp.sum(y2 * y2, axis=0, keepdims=True)
    stats_ref[2:3, :] = jnp.sum(d, axis=0, keepdims=True)
    stats_ref[3:4, :] = jnp.sum(d * d, axis=0, keepdims=True)


# ---------------------------------------------------------------------------
# Kernel 3: apply BN (precomputed scale/bias) + ReLU  (y1 epilogue, bf16 I/O)
# ---------------------------------------------------------------------------
def bn_relu_kernel(y_ref, scale_ref, bias_ref, out_ref):
    y = y_ref[...].astype(jnp.float32)
    out_ref[...] = jnp.maximum(
        y * scale_ref[...] + bias_ref[...], 0.0).astype(out_ref.dtype)


# ---------------------------------------------------------------------------
# Kernel 4a: main-branch BN + residual-branch BN + add + final ReLU
# ---------------------------------------------------------------------------
def bn_add_relu_kernel(y2_ref, d_ref, s2_ref, b2_ref, sd_ref, bd_ref, out_ref):
    main = y2_ref[...].astype(jnp.float32) * s2_ref[...] + b2_ref[...]
    res = d_ref[...].astype(jnp.float32) * sd_ref[...] + bd_ref[...]
    out_ref[...] = jnp.maximum(main + res, 0.0).astype(out_ref.dtype)


# ---------------------------------------------------------------------------
# Kernel 4b: main-branch BN + identity residual (exact f32 feats) + ReLU
# ---------------------------------------------------------------------------
def bn_add_identity_relu_kernel(y2_ref, x_ref, s2_ref, b2_ref, out_ref):
    main = y2_ref[...].astype(jnp.float32) * s2_ref[...] + b2_ref[...]
    out_ref[...] = jnp.maximum(
        main + x_ref[...].astype(jnp.float32), 0.0).astype(out_ref.dtype)


# ---------------------------------------------------------------------------
# Wrappers — every grid axis is "parallel" (per-tile outputs only).
# ---------------------------------------------------------------------------
def _conv_stats(xg, w, nt):
    npad, kc = xg.shape
    cout = w.shape[1]
    ntiles = npad // nt
    return pl.pallas_call(
        conv_stats_kernel,
        out_shape=(jax.ShapeDtypeStruct((npad, cout), jnp.bfloat16),
                   jax.ShapeDtypeStruct((ntiles, 8, cout), jnp.float32)),
        grid_spec=pltpu.PrefetchScalarGridSpec(
            num_scalar_prefetch=0, grid=(ntiles,),
            in_specs=[pl.BlockSpec((nt, kc), lambda i: (i, 0)),
                      pl.BlockSpec((kc, cout), lambda i: (0, 0))],
            out_specs=(pl.BlockSpec((nt, cout), lambda i: (i, 0)),
                       pl.BlockSpec((None, 8, cout), lambda i: (i, 0, 0)))),
        compiler_params=pltpu.CompilerParams(
            dimension_semantics=("parallel",),
            vmem_limit_bytes=VMEM_LIMIT),
        cost_estimate=pl.CostEstimate(
            flops=2 * npad * kc * cout, transcendentals=0,
            bytes_accessed=(npad * kc * 2 + kc * cout * 2 + npad * cout * 2
                            + ntiles * 8 * cout * 4)),
    )(xg, w)


def _conv_ds_stats(yg, w2, x, wd, nt):
    npad, kc = yg.shape
    cout = w2.shape[1]
    cin = x.shape[1]
    ntiles = npad // nt
    return pl.pallas_call(
        conv_ds_stats_kernel,
        out_shape=(jax.ShapeDtypeStruct((npad, cout), jnp.bfloat16),
                   jax.ShapeDtypeStruct((npad, cout), jnp.bfloat16),
                   jax.ShapeDtypeStruct((ntiles, 8, cout), jnp.float32)),
        grid_spec=pltpu.PrefetchScalarGridSpec(
            num_scalar_prefetch=0, grid=(ntiles,),
            in_specs=[pl.BlockSpec((nt, kc), lambda i: (i, 0)),
                      pl.BlockSpec((kc, cout), lambda i: (0, 0)),
                      pl.BlockSpec((nt, cin), lambda i: (i, 0)),
                      pl.BlockSpec((cin, cout), lambda i: (0, 0))],
            out_specs=(pl.BlockSpec((nt, cout), lambda i: (i, 0)),
                       pl.BlockSpec((nt, cout), lambda i: (i, 0)),
                       pl.BlockSpec((None, 8, cout), lambda i: (i, 0, 0)))),
        compiler_params=pltpu.CompilerParams(
            dimension_semantics=("parallel",),
            vmem_limit_bytes=VMEM_LIMIT),
        cost_estimate=pl.CostEstimate(
            flops=2 * npad * kc * cout + 2 * npad * cin * cout,
            transcendentals=0,
            bytes_accessed=(npad * kc * 2 + kc * cout * 2 + npad * cin * 2
                            + cin * cout * 2 + 2 * npad * cout * 2
                            + ntiles * 8 * cout * 4)),
    )(yg, w2, x, wd)


def _bn_relu(y, scale, bias, nt, out_dtype):
    npad, cout = y.shape
    spec_n = pl.BlockSpec((nt, cout), lambda i: (i, 0))
    spec_1 = pl.BlockSpec((1, cout), lambda i: (0, 0))
    return pl.pallas_call(
        bn_relu_kernel,
        out_shape=jax.ShapeDtypeStruct((npad, cout), out_dtype),
        grid_spec=pltpu.PrefetchScalarGridSpec(
            num_scalar_prefetch=0, grid=(npad // nt,),
            in_specs=[spec_n, spec_1, spec_1],
            out_specs=spec_n),
        compiler_params=pltpu.CompilerParams(dimension_semantics=("parallel",)),
    )(y, scale, bias)


def _bn_add_relu(y2, d, s2, b2, sd, bd, nt):
    npad, cout = y2.shape
    spec_n = pl.BlockSpec((nt, cout), lambda i: (i, 0))
    spec_1 = pl.BlockSpec((1, cout), lambda i: (0, 0))
    return pl.pallas_call(
        bn_add_relu_kernel,
        out_shape=jax.ShapeDtypeStruct((npad, cout), jnp.float32),
        grid_spec=pltpu.PrefetchScalarGridSpec(
            num_scalar_prefetch=0, grid=(npad // nt,),
            in_specs=[spec_n, spec_n, spec_1, spec_1, spec_1, spec_1],
            out_specs=spec_n),
        compiler_params=pltpu.CompilerParams(dimension_semantics=("parallel",)),
    )(y2, d, s2, b2, sd, bd)


def _bn_add_identity_relu(y2, x, s2, b2, nt):
    npad, cout = y2.shape
    spec_n = pl.BlockSpec((nt, cout), lambda i: (i, 0))
    spec_1 = pl.BlockSpec((1, cout), lambda i: (0, 0))
    return pl.pallas_call(
        bn_add_identity_relu_kernel,
        out_shape=jax.ShapeDtypeStruct((npad, cout), jnp.float32),
        grid_spec=pltpu.PrefetchScalarGridSpec(
            num_scalar_prefetch=0, grid=(npad // nt,),
            in_specs=[spec_n, spec_n, spec_1, spec_1],
            out_specs=spec_n),
        compiler_params=pltpu.CompilerParams(dimension_semantics=("parallel",)),
    )(y2, x, s2, b2)


def _bn_scale_bias(s, ss, gamma, beta, n):
    # Training-mode BatchNorm1d (biased variance) from global sum / sum-sq.
    mean = s / n
    var = jnp.maximum(ss / n - mean * mean, 0.0)
    scale = gamma * jax.lax.rsqrt(var + EPS)
    bias = beta - mean * scale
    return scale, bias


def _gather_flat(f, idx_pad):
    # f: [n, C]; idx_pad: [npad, K] with values in [0, n] (n = zero row).
    # TODO(synk): move this gather into the Pallas kernels (DMA / VMEM gather).
    n, c = f.shape
    fe = jnp.concatenate([f, jnp.zeros((1, c), f.dtype)], axis=0)
    g = jnp.take(fe, idx_pad, axis=0)                     # [npad, K, C]
    return g.reshape(idx_pad.shape[0], idx_pad.shape[1] * c)


# ---------------------------------------------------------------------------
# Full ResidualBlock forward
# ---------------------------------------------------------------------------
def residual_block_forward(feats, nbr, params, use_downsample, nt=512):
    n, inc = feats.shape
    k = nbr.shape[0]
    cout = params["w1"].shape[2]

    nt = max(8, min(nt, _round_up(n, 8)))   # tile (multiple of 8 sublanes)
    npad = _round_up(n, nt)

    # Neighbor indices [npad, K]; -1 and padding rows -> appended zero row (n).
    idx = jnp.where(nbr >= 0, nbr, n).T.astype(jnp.int32)          # [n, K]
    idx_pad = jnp.pad(idx, ((0, npad - n), (0, 0)), constant_values=n)

    w1 = params["w1"].reshape(k * inc, cout).astype(jnp.bfloat16)
    w2 = params["w2"].reshape(k * cout, cout).astype(jnp.bfloat16)

    # ---- conv1 (+ per-tile BN partials), then BN+ReLU with global stats ----
    xg = _gather_flat(feats.astype(jnp.bfloat16), idx_pad)
    y1_raw, st1 = _conv_stats(xg, w1, nt)
    st1 = jnp.sum(st1, axis=0)                                     # (8, cout)
    s1, b1 = _bn_scale_bias(st1[0:1], st1[1:2], params["g1"], params["b1"], n)
    y1 = _bn_relu(y1_raw, s1, b1, nt, jnp.bfloat16)

    # ---- conv2 (+ residual branch) ----
    yg = _gather_flat(y1[:n], idx_pad)

    if use_downsample:
        x_bf = jnp.pad(feats, ((0, npad - n), (0, 0))).astype(jnp.bfloat16)
        wd = params["wd"].astype(jnp.bfloat16)
        y2_raw, d_raw, st2 = _conv_ds_stats(yg, w2, x_bf, wd, nt)
        st2 = jnp.sum(st2, axis=0)
        s2, b2 = _bn_scale_bias(st2[0:1], st2[1:2],
                                params["g2"], params["b2"], n)
        sd, bd = _bn_scale_bias(st2[2:3], st2[3:4],
                                params["gd"], params["bd"], n)
        out = _bn_add_relu(y2_raw, d_raw, s2, b2, sd, bd, nt)
    else:
        # Identity residual: no x through the conv kernel, no d tensor/stats.
        y2_raw, st2 = _conv_stats(yg, w2, nt)
        st2 = jnp.sum(st2, axis=0)
        s2, b2 = _bn_scale_bias(st2[0:1], st2[1:2],
                                params["g2"], params["b2"], n)
        x_pad = jnp.pad(feats, ((0, npad - n), (0, 0))).astype(jnp.float32)
        out = _bn_add_identity_relu(y2_raw, x_pad, s2, b2, nt)

    return out[:n]


# ---------------------------------------------------------------------------
# Pure-JAX f32 reference (matches the PyTorch module's forward semantics)
# ---------------------------------------------------------------------------
def reference_forward(feats, nbr, params, use_downsample):
    n = feats.shape[0]

    def gather(f):
        fe = jnp.concatenate([f, jnp.zeros((1, f.shape[1]), f.dtype)], axis=0)
        return fe[jnp.where(nbr >= 0, nbr, n)]       # [K, N, C]

    def conv(f, w):
        return jnp.einsum("knc,kcd->nd", gather(f), w)

    def bn(x, g, b):
        m = jnp.mean(x, axis=0, keepdims=True)
        v = jnp.mean((x - m) ** 2, axis=0, keepdims=True)
        return (x - m) * jax.lax.rsqrt(v + EPS) * g + b

    y1 = jax.nn.relu(bn(conv(feats, params["w1"]), params["g1"], params["b1"]))
    y2 = bn(conv(y1, params["w2"]), params["g2"], params["b2"])
    if use_downsample:
        res = bn(feats @ params["wd"], params["gd"], params["bd"])
    else:
        res = feats
    return jax.nn.relu(y2 + res)


# ---------------------------------------------------------------------------
if __name__ == "__main__":
    G = 8                               # voxel grid extent
    N = 256                             # number of active voxels
    ks = 3
    K = ks ** 3

    key = jax.random.PRNGKey(0)
    kcoord, kf1, kf2, kw = jax.random.split(key, 4)

    # deterministic set of N distinct voxel coordinates inside a GxGxG grid
    perm = np.asarray(jax.random.permutation(kcoord, G ** 3))
    sel = np.sort(perm[:N])
    coords = np.stack([sel // (G * G), (sel // G) % G, sel % G],
                      axis=1).astype(np.int32)

    # host-side kernel-map construction (coordinate hashing)
    lut = {tuple(c): i for i, c in enumerate(coords.tolist())}
    offsets = [(dz, dy, dx) for dz in (-1, 0, 1)
               for dy in (-1, 0, 1) for dx in (-1, 0, 1)]
    nbr_np = np.full((K, N), -1, dtype=np.int32)
    for kk, (dz, dy, dx) in enumerate(offsets):
        for i, (z, y, x) in enumerate(coords.tolist()):
            nbr_np[kk, i] = lut.get((z + dz, y + dy, x + dx), -1)
    nbr = jnp.asarray(nbr_np)

    def make_params(rng, inc, outc, with_ds):
        k0, k1, k2 = jax.random.split(rng, 3)
        p = dict(
            w1=jax.random.normal(k0, (K, inc, outc), jnp.float32)
            / np.sqrt(K * inc),
            g1=jnp.ones((1, outc), jnp.float32),
            b1=jnp.zeros((1, outc), jnp.float32),
            w2=jax.random.normal(k1, (K, outc, outc), jnp.float32)
            / np.sqrt(K * outc),
            g2=jnp.ones((1, outc), jnp.float32),
            b2=jnp.zeros((1, outc), jnp.float32),
        )
        if with_ds:
            p.update(
                wd=jax.random.normal(k2, (inc, outc), jnp.float32)
                / np.sqrt(inc),
                gd=jnp.ones((1, outc), jnp.float32),
                bd=jnp.zeros((1, outc), jnp.float32))
        return p

    # ---- Case 1: inc != outc -> downsample branch (1x1 conv + BN) ----
    inc1, outc1 = 16, 32
    feats1 = jax.random.normal(kf1, (N, inc1), jnp.float32)
    params1 = make_params(jax.random.fold_in(kw, 0), inc1, outc1, True)
    out1 = residual_block_forward(feats1, nbr, params1,
                                  use_downsample=True, nt=512)
    jax.block_until_ready(out1)
    ref1 = reference_forward(feats1, nbr, params1, True)
    err1 = float(jnp.max(jnp.abs(out1 - ref1)))
    assert out1.shape == (N, outc1)
    assert err1 < 0.2, f"downsample path: max abs error too large: {err1}"

    # ---- Case 2: inc == outc -> identity residual ----
    inc2 = outc2 = 32
    feats2 = jax.random.normal(kf2, (N, inc2), jnp.float32)
    params2 = make_params(jax.random.fold_in(kw, 1), inc2, outc2, False)
    out2 = residual_block_forward(feats2, nbr, params2,
                                  use_downsample=False, nt=512)
    jax.block_until_ready(out2)
    ref2 = reference_forward(feats2, nbr, params2, False)
    err2 = float(jnp.max(jnp.abs(out2 - ref2)))
    assert out2.shape == (N, outc2)
    assert err2 < 0.2, f"identity path: max abs error too large: {err2}"

    print("KERNEL_OK")
</pallas_src>

<mosaic_0001>
module attributes {stable_mosaic.version = 11 : i64} {
  func.func @conv_stats_kernel(%arg0: i32, %arg1: memref<256x432xbf16, #tpu.memory_space<vmem>>, %arg2: memref<432x32xbf16, #tpu.memory_space<vmem>>, %arg3: memref<256x32xbf16, #tpu.memory_space<vmem>>, %arg4: memref<1x8x32xf32, #tpu.memory_space<vmem>>) attributes {dimension_semantics = [#tpu.dimension_semantics<parallel>], iteration_bounds = array<i64: 1>, scalar_prefetch = 0 : i64, scratch_operands = 0 : i64, tpu.core_type = #tpu.core_type<tc>, window_params = [{transform_indices = @transform_0, window_bounds = array<i64: 256, 432>}, {pipeline_mode = #tpu.pipeline_mode<synchronous>, transform_indices = @transform_1, window_bounds = array<i64: 432, 32>}, {transform_indices = @transform_2, window_bounds = array<i64: 256, 32>}, {transform_indices = @transform_3, window_bounds = array<i64: 1, 8, 32>}]} {
    %c0 = arith.constant 0 : index
    %c0_0 = arith.constant 0 : index
    %0 = vector.load %arg1[%c0, %c0_0] : memref<256x432xbf16, #tpu.memory_space<vmem>>, vector<256x432xbf16>
    %c0_1 = arith.constant 0 : index
    %c0_2 = arith.constant 0 : index
    %1 = vector.load %arg2[%c0_1, %c0_2] : memref<432x32xbf16, #tpu.memory_space<vmem>>, vector<432x32xbf16>
    %cst = arith.constant dense<0.000000e+00> : vector<256x32xf32>
    %2 = tpu.matmul %0, %1, %cst {dimension_numbers = #tpu.dot_dimension_numbers<[1], [0], [0], [1], [0, 0, 1, 1], [], []>} : vector<256x432xbf16>, vector<432x32xbf16>, vector<256x32xf32> -> vector<256x32xf32>
    %3 = arith.truncf %2 : vector<256x32xf32> to vector<256x32xbf16>
    %c0_3 = arith.constant 0 : index
    %c0_4 = arith.constant 0 : index
    %4 = vector.load %arg3[%c0_3, %c0_4] : memref<256x32xbf16, #tpu.memory_space<vmem>>, vector<256x32xbf16>
    tpu.vector_store %arg3[%c0_3, %c0_4], %3 {strides = array<i32>} : memref<256x32xbf16, #tpu.memory_space<vmem>>, vector<256x32xbf16>,
    %cst_5 = arith.constant 0.000000e+00 : f32
    %5 = vector.broadcast %cst_5 : f32 to vector<8x32xf32>
    %c0_6 = arith.constant 0 : index
    %c0_7 = arith.constant 0 : index
    %c0_8 = arith.constant 0 : index
    %6 = vector.load %arg4[%c0_6, %c0_7, %c0_8] : memref<1x8x32xf32, #tpu.memory_space<vmem>>, vector<1x8x32xf32>
    %7 = vector.shape_cast %6 : vector<1x8x32xf32> to vector<8x32xf32>
    %8 = vector.shape_cast %5 : vector<8x32xf32> to vector<1x8x32xf32>
    tpu.vector_store %arg4[%c0_6, %c0_7, %c0_8], %8 {strides = array<i32>} : memref<1x8x32xf32, #tpu.memory_space<vmem>>, vector<1x8x32xf32>,
    %cst_9 = arith.constant dense<0.000000e+00> : vector<32xf32>
    %9 = vector.multi_reduction <add>, %2, %cst_9 [0] : vector<256x32xf32> to vector<32xf32>
    %10 = vector.shape_cast %9 : vector<32xf32> to vector<1x32xf32>
    %c0_10 = arith.constant 0 : index
    %c0_11 = arith.constant 0 : index
    %c0_12 = arith.constant 0 : index
    %11 = vector.load %arg4[%c0_10, %c0_11, %c0_12] : memref<1x8x32xf32, #tpu.memory_space<vmem>>, vector<1x1x32xf32>
    %12 = vector.shape_cast %11 : vector<1x1x32xf32> to vector<1x32xf32>
    %13 = vector.shape_cast %10 : vector<1x32xf32> to vector<1x1x32xf32>
    tpu.vector_store %arg4[%c0_10, %c0_11, %c0_12], %13 {strides = array<i32>} : memref<1x8x32xf32, #tpu.memory_space<vmem>>, vector<1x1x32xf32>,
    %14 = arith.mulf %2, %2 : vector<256x32xf32>
    %cst_13 = arith.constant dense<0.000000e+00> : vector<32xf32>
    %15 = vector.multi_reduction <add>, %14, %cst_13 [0] : vector<256x32xf32> to vector<32xf32>
    %16 = vector.shape_cast %15 : vector<32xf32> to vector<1x32xf32>
    %c0_14 = arith.constant 0 : index
    %c1 = arith.constant 1 : index
    %c0_15 = arith.constant 0 : index
    %17 = vector.load %arg4[%c0_14, %c1, %c0_15] : memref<1x8x32xf32, #tpu.memory_space<vmem>>, vector<1x1x32xf32>
    %18 = vector.shape_cast %17 : vector<1x1x32xf32> to vector<1x32xf32>
    %19 = vector.shape_cast %16 : vector<1x32xf32> to vector<1x1x32xf32>
    tpu.vector_store %arg4[%c0_14, %c1, %c0_15], %19 {strides = array<i32>} : memref<1x8x32xf32, #tpu.memory_space<vmem>>, vector<1x1x32xf32>,
    return
  }
  func.func @transform_0(%arg0: i32) -> (i32, i32) {
    %c0_i32 = arith.constant 0 : i32
    %c0_i32_0 = arith.constant 0 : i32
    return %arg0, %c0_i32 : i32, i32
  }
  func.func @transform_1(%arg0: i32) -> (i32, i32) {
    %c0_i32 = arith.constant 0 : i32
    %c0_i32_0 = arith.constant 0 : i32
    %c0_i32_1 = arith.constant 0 : i32
    return %c0_i32, %c0_i32_0 : i32, i32
  }
  func.func @transform_2(%arg0: i32) -> (i32, i32) {
    %c0_i32 = arith.constant 0 : i32
    %c0_i32_0 = arith.constant 0 : i32
    return %arg0, %c0_i32 : i32, i32
  }
  func.func @transform_3(%arg0: i32) -> (i32, i32, i32) {
    %c0_i32 = arith.constant 0 : i32
    %c0_i32_0 = arith.constant 0 : i32
    %c0_i32_1 = arith.constant 0 : i32
    return %arg0, %c0_i32, %c0_i32_0 : i32, i32, i32
  }
}

</mosaic_0001>

<bundles_post_ra>
// kernel: tpu_custom_call.1
= control target key start
LH: loop header
LB: loop body
LE: loop exit
PB: predicated region body
PF: predicated region fallthrough
CT: control target
= control target key end

     0   :  { %v1757_v1 = vmov 0   ;;  %vm599_vm0 = vcmask 392192   ;;  %s2285_s0 = inlined_call_operand.vmem [shape: bf16[256,432], index: 0, kind: input, shape index: {}]   ;;  %s2286_s1 = inlined_call_operand.vmem [shape: bf16[432,32], index: 1, kind: input, shape index: {}]   ;;  %s2287_s2 = inlined_call_operand.vmem [shape: bf16[256,32], index: 2, kind: output, shape index: {0}]   ;;  %s2288_s3 = inlined_call_operand.hbm [shape: f32[1,8,32], index: 3, kind: output, shape index: {1}]  }
   0x1   :  { %v1610_v0 = vld [vmem:[%s2286_s1 + $0x80] sm:$0xff]   ;;  %809 = vmatprep.subr.bf16.mxu1 %v1757_v1  ;;  %v1611_v2 = vld [vmem:[%s2286_s1 + $0x88] sm:$0xff]   ;;  %v1614_v5 = vld [vmem:[%s2286_s1 + $0x90] sm:$0xff]  }
   0x2   :  { %810 = vmatpush1.bf16.msra.mxu1 %v1610_v0  ;;  %v1612_v3 = vld [vmem:[%s2286_s1 + $0x40] sm:$0xff]   ;;  %v1615_v6 = vld [vmem:[%s2286_s1 + $0x48] sm:$0xff]   ;;  %v1618_v8 = vld [vmem:[%s2286_s1 + $0x50] sm:$0xff]  }
   0x3   :  { %811 = vmatprep.subr.bf16.mxu1 %v1757_v1  ;;  %v1613_v4 = vld [vmem:[%s2286_s1] sm:$0xff]   ;;  %1495 = vmatprep.subr.bf16.mxu0 %v1612_v3  ;;  %v1616_v7 = vld [vmem:[%s2286_s1 + $0x8] sm:$0xff]   ;;  %v1619_v9 = vld [vmem:[%s2286_s1 + $0x10] sm:$0xff]  }
   0x4   :  { %1496 = vmatpush3.bf16.msra.mxu0 %v1613_v4  ;;  %v1617_v10 = vld [vmem:[%s2286_s1 + $0x98] sm:$0xff]   ;;  %v1620_v12 = vld [vmem:[%s2286_s1 + $0xa0] sm:$0xff]   ;;  %v1623_v15 = vld [vmem:[%s2286_s1 + $0xa8] sm:$0xff]  }
   0x5   :  { %1497 = vmatprep.subr.bf16.mxu0 %v1615_v6  ;;  %v1621_v11 = vld [vmem:[%s2286_s1 + $0x58] sm:$0xff]   ;;  %v1624_v14 = vld [vmem:[%s2286_s1 + $0x60] sm:$0xff]   ;;  %v1627_v17 = vld [vmem:[%s2286_s1 + $0x68] sm:$0xff]  }
   0x6   :  { %812 = vmatpush1.bf16.msra.mxu1 %v1611_v2  ;;  %v1622_v13 = vld [vmem:[%s2286_s1 + $0x18] sm:$0xff]   ;;  %v1625_v16 = vld [vmem:[%s2286_s1 + $0x20] sm:$0xff]   ;;  %v1626_v18 = vld [vmem:[%s2286_s1 + $0xb0] sm:$0xff]  }
   0x7   :  { %813 = vmatprep.subr.bf16.mxu1 %v1757_v1  ;;  %v1628_v19 = vld [vmem:[%s2286_s1 + $0x28] sm:$0xff]   ;;  %v1630_v20 = vld [vmem:[%s2286_s1 + $0x70] sm:$0xff]   ;;  %v1629_v21 = vld [vmem:[%s2286_s1 + $0xb8] sm:$0xff]  }
   0x8   :  { %1498 = vmatpush3.bf16.msra.mxu0 %v1616_v7  ;;  %v1631_v22 = vld [vmem:[%s2286_s1 + $0x30] sm:$0xff]   ;;  %v1633_v23 = vld [vmem:[%s2286_s1 + $0x78] sm:$0xff]   ;;  %v1632_v27 = vld [vmem:[%s2286_s1 + $0xc0] sm:$0xff]  }
   0x9   :  { %1499 = vmatprep.subr.bf16.mxu0 %v1618_v8  ;;  %v1637_v24 = vld [vmem:[%s2285_s0 + $0x4] ss:$16 sps:$4 sm:$0xff]   ;;  %v1634_v25 = vld [vmem:[%s2286_s1 + $0x38] sm:$0xff]   ;;  %v1635_v28 = vld [vmem:[%s2285_s0] ss:$16 sps:$4 sm:$0xff]  }
   0xa   :  { %814 = vmatpush1.bf16.msra.mxu1 %v1614_v5  ;;  %680 = vmatprep.mubr.bf16.mxu0 %v1637_v24  ;;  %v1642_v26 = vld [vmem:[%s2285_s0 + $0xc] ss:$16 sps:$4 sm:$0xff]   ;;  %v1643_v29 = vld [vmem:[%s2285_s0 + $0x24] ss:$16 sps:$4 sm:$0xff]   ;;  %v1645_v32 = vld [vmem:[%s2285_s0 + $0x20] ss:$16 sps:$4 sm:$0xff]  }
   0xb   :  { %815 = vmatprep.subr.bf16.mxu1 %v1757_v1  ;;  %1415 = vmatprep.mubr.msk.bf16.mxu1 %vm599_vm0, %v1642_v26  ;;  %v1638_v30 = vld [vmem:[%s2286_s1 + $0xc8] sm:$0xff]   ;;  %v1639_v31 = vld [vmem:[%s2286_s1 + $0xd0] sm:$0xff]  }
   0xc   :  { %1500 = vmatpush3.bf16.msra.mxu0 %v1619_v9  ;;  %v1640_v33 = vld [vmem:[%s2285_s0 + $0x8] ss:$16 sps:$4 sm:$0xff]   ;;  %v1649_v34 = vld [vmem:[%s2285_s0 + $0x44] ss:$16 sps:$4 sm:$0xff]   ;;  %v1646_v35 = vld [vmem:[%s2285_s0 + $0x2c] ss:$16 sps:$4 sm:$0xff]  }
   0xd   :  { %1501 = vmatprep.subr.bf16.mxu0 %v1621_v11  ;;  %v1651_v36 = vld [vmem:[%s2285_s0 + $0x40] ss:$16 sps:$4 sm:$0xff]   ;;  %v1648_v37 = vld [vmem:[%s2285_s0 + $0x28] ss:$16 sps:$4 sm:$0xff]   ;;  %v1655_v38 = vld [vmem:[%s2285_s0 + $0x64] ss:$16 sps:$4 sm:$0xff]  }
   0xe   :  { %816 = vmatpush1.bf16.msra.mxu1 %v1617_v10  ;;  %v1652_v39 = vld [vmem:[%s2285_s0 + $0x4c] ss:$16 sps:$4 sm:$0xff]   ;;  %v1657_v40 = vld [vmem:[%s2285_s0 + $0x60] ss:$16 sps:$4 sm:$0xff]   ;;  %v1654_v41 = vld [vmem:[%s2285_s0 + $0x48] ss:$16 sps:$4 sm:$0xff]  }
   0xf   :  { %817 = vmatprep.subr.bf16.mxu1 %v1757_v1  ;;  %v1661_v42 = vld [vmem:[%s2285_s0 + $0x84] ss:$16 sps:$4 sm:$0xff]   ;;  %v1658_v43 = vld [vmem:[%s2285_s0 + $0x6c] ss:$16 sps:$4 sm:$0xff]   ;;  %v1663_v44 = vld [vmem:[%s2285_s0 + $0x80] ss:$16 sps:$4 sm:$0xff]  }
  0x10   :  { %1502 = vmatpush3.bf16.msra.mxu0 %v1622_v13  ;;  %v1660_v45 = vld [vmem:[%s2285_s0 + $0x68] ss:$16 sps:$4 sm:$0xff]   ;;  %v1667_v46 = vld [vmem:[%s2285_s0 + $0xa4] ss:$16 sps:$4 sm:$0xff]   ;;  %v1664_v47 = vld [vmem:[%s2285_s0 + $0x8c] ss:$16 sps:$4 sm:$0xff]  }
  0x11   :  { %1503 = vmatprep.subr.bf16.mxu0 %v1624_v14 }
  0x12   :  { %818 = vmatpush1.bf16.msra.mxu1 %v1620_v12 }
  0x13   :  { %819 = vmatprep.subr.bf16.mxu1 %v1757_v1 }
  0x14   :  { %1504 = vmatpush3.bf16.msra.mxu0 %v1625_v16 }
  0x15   :  { %1505 = vmatprep.subr.bf16.mxu0 %v1627_v17 }
  0x16   :  { %820 = vmatpush1.bf16.msra.mxu1 %v1623_v15 }
  0x17   :  { %821 = vmatprep.subr.bf16.mxu1 %v1757_v1 }
  0x18   :  { %1506 = vmatpush3.bf16.msra.mxu0 %v1628_v19 }
  0x19   :  { %1507 = vmatprep.subr.bf16.mxu0 %v1630_v20 }
  0x1a   :  { %822 = vmatpush1.bf16.msra.mxu1 %v1626_v18 }
  0x1b   :  { %823 = vmatprep.subr.bf16.mxu1 %v1757_v1 }
  0x1c   :  { %1508 = vmatpush3.bf16.msra.mxu0 %v1631_v22 }
  0x1d   :  { %1509 = vmatprep.subr.bf16.mxu0 %v1633_v23 }
  0x1e   :  { %824 = vmatpush1.bf16.msra.mxu1 %v1629_v21 }
  0x1f   :  { %825 = vmatprep.subr.bf16.mxu1 %v1757_v1 }
  0x20   :  { %1510 = vmatpush3.bf16.msra.mxu0 %v1634_v25 }
  0x22   :  { %826 = vmatpush1.bf16.msra.mxu1 %v1632_v27 }
  0x23   :  { %827 = vmatprep.subr.bf16.mxu1 %v1757_v1  ;;  %681 = vmatmul.mubr.bf16.vlgmr.msra.gmra.mrb[0].mxu0 %v1635_v28 }
  0x24   :  { %688 = vmatprep.mubr.bf16.mxu0 %v1643_v29 }
  0x26   :  { %828 = vmatpush1.bf16.msra.mxu1 %v1638_v30 }
  0x27   :  { %829 = vmatprep.subr.bf16.mxu1 %v1757_v1 }
  0x2a   :  { %830 = vmatpush1.bf16.msra.mxu1 %v1639_v31 }
  0x2b   :  { %689 = vmatmul.mubr.bf16.gmra.mrb[4].mxu0 %v1645_v32 }
  0x2c   :  { %696 = vmatprep.mubr.bf16.mxu0 %v1649_v34 }
  0x2d   :  { %842 = vmatmul.mubr.bf16.vlgmr.msra.gmra.mrb[0].mxu1 %v1640_v33 }
  0x2e   :  { %1416 = vmatprep.mubr.msk.bf16.mxu1 %vm599_vm0, %v1646_v35 }
  0x33   :  { %697 = vmatmul.mubr.bf16.gmra.mrb[8].mxu0 %v1651_v36 }
  0x34   :  { %704 = vmatprep.mubr.bf16.mxu0 %v1655_v38 }
  0x35   :  { %850 = vmatmul.mubr.bf16.gmra.mrb[4].mxu1 %v1648_v37 }
  0x36   :  { %1417 = vmatprep.mubr.msk.bf16.mxu1 %vm599_vm0, %v1652_v39 }
  0x3b   :  { %705 = vmatmul.mubr.bf16.gmra.mrb[12].mxu0 %v1657_v40 }
  0x3c   :  { %712 = vmatprep.mubr.bf16.mxu0 %v1661_v42 }
  0x3d   :  { %858 = vmatmul.mubr.bf16.gmra.mrb[8].mxu1 %v1654_v41 }
  0x3e   :  { %1418 = vmatprep.mubr.msk.bf16.mxu1 %vm599_vm0, %v1658_v43 }
  0x43   :  { %713 = vmatmul.mubr.bf16.gmra.mrb[16].mxu0 %v1663_v44 }
  0x44   :  { %720 = vmatprep.mubr.bf16.mxu0 %v1667_v46 }
  0x45   :  { %866 = vmatmul.mubr.bf16.gmra.mrb[12].mxu1 %v1660_v45 }
  0x46   :  { %9 = vsyncpa [#allocation3], 0  ;;  %1419 = vmatprep.mubr.msk.bf16.mxu1 %vm599_vm0, %v1664_v47  ;;  %v1669_v48 = vld [vmem:[%s2285_s0 + $0xa0] ss:$16 sps:$4 sm:$0xff]   ;;  %v1666_v49 = vld [vmem:[%s2285_s0 + $0x88] ss:$16 sps:$4 sm:$0xff]  }
  0x47   :  { %v1673_v50 = vld [vmem:[%s2285_s0 + $0xc4] ss:$16 sps:$4 sm:$0xff]   ;;  %v1670_v51 = vld [vmem:[%s2285_s0 + $0xac] ss:$16 sps:$4 sm:$0xff]   ;;  %v1675_v52 = vld [vmem:[%s2285_s0 + $0xc0] ss:$16 sps:$4 sm:$0xff]  }
  0x48   :  { %v1672_v53 = vld [vmem:[%s2285_s0 + $0xa8] ss:$16 sps:$4 sm:$0xff]   ;;  %v1679_v54 = vld [vmem:[%s2285_s0 + $0xe4] ss:$16 sps:$4 sm:$0xff]   ;;  %v1676_v55 = vld [vmem:[%s2285_s0 + $0xcc] ss:$16 sps:$4 sm:$0xff]  }
  0x49   :  { %v1681_v56 = vld [vmem:[%s2285_s0 + $0xe0] ss:$16 sps:$4 sm:$0xff]   ;;  %v1678_v57 = vld [vmem:[%s2285_s0 + $0xc8] ss:$16 sps:$4 sm:$0xff]   ;;  %v1685_v58 = vld [vmem:[%s2285_s0 + $0x104] ss:$16 sps:$4 sm:$0xff]  }
  0x4a   :  { %v1682_v59 = vld [vmem:[%s2285_s0 + $0xec] ss:$16 sps:$4 sm:$0xff]   ;;  %v1687_v60 = vld [vmem:[%s2285_s0 + $0x100] ss:$16 sps:$4 sm:$0xff]   ;;  %v1684_v61 = vld [vmem:[%s2285_s0 + $0xe8] ss:$16 sps:$4 sm:$0xff]  }
  0x4b   :  { %721 = vmatmul.mubr.bf16.gmra.mrb[20].mxu0 %v1669_v48  ;;  %v1691_v62 = vld [vmem:[%s2285_s0 + $0x124] ss:$16 sps:$4 sm:$0xff]   ;;  %v1688_v63 = vld [vmem:[%s2285_s0 + $0x10c] ss:$16 sps:$4 sm:$0xff]   ;;  %v1693_v0 = vld [vmem:[%s2285_s0 + $0x120] ss:$16 sps:$4 sm:$0xff]  }
  0x4c   :  { %728 = vmatprep.mubr.bf16.mxu0 %v1673_v50  ;;  %v1690_v1 = vld [vmem:[%s2285_s0 + $0x108] ss:$16 sps:$4 sm:$0xff]   ;;  %v1697_v2 = vld [vmem:[%s2285_s0 + $0x144] ss:$16 sps:$4 sm:$0xff]   ;;  %v1694_v3 = vld [vmem:[%s2285_s0 + $0x12c] ss:$16 sps:$4 sm:$0xff]  }
  0x4d   :  { %874 = vmatmul.mubr.bf16.gmra.mrb[16].mxu1 %v1666_v49  ;;  %v1699_v4 = vld [vmem:[%s2285_s0 + $0x140] ss:$16 sps:$4 sm:$0xff]   ;;  %v1696_v5 = vld [vmem:[%s2285_s0 + $0x128] ss:$16 sps:$4 sm:$0xff]   ;;  %v1703_v6 = vld [vmem:[%s2285_s0 + $0x164] ss:$16 sps:$4 sm:$0xff]  }
  0x4e   :  { %1420 = vmatprep.mubr.msk.bf16.mxu1 %vm599_vm0, %v1670_v51  ;;  %v1700_v7 = vld [vmem:[%s2285_s0 + $0x14c] ss:$16 sps:$4 sm:$0xff]   ;;  %v1705_v8 = vld [vmem:[%s2285_s0 + $0x160] ss:$16 sps:$4 sm:$0xff]   ;;  %v1702_v9 = vld [vmem:[%s2285_s0 + $0x148] ss:$16 sps:$4 sm:$0xff]  }
  0x4f   :  { %v1709_v10 = vld [vmem:[%s2285_s0 + $0x184] ss:$16 sps:$4 sm:$0xff]   ;;  %v1706_v11 = vld [vmem:[%s2285_s0 + $0x16c] ss:$16 sps:$4 sm:$0xff]   ;;  %v1711_v12 = vld [vmem:[%s2285_s0 + $0x180] ss:$16 sps:$4 sm:$0xff]  }
  0x50   :  { %v1708_v13 = vld [vmem:[%s2285_s0 + $0x168] ss:$16 sps:$4 sm:$0xff]   ;;  %v1715_v14 = vld [vmem:[%s2285_s0 + $0x1a4] ss:$16 sps:$4 sm:$0xff]   ;;  %v1712_v15 = vld [vmem:[%s2285_s0 + $0x18c] ss:$16 sps:$4 sm:$0xff]  }
  0x51   :  { %v1717_v16 = vld [vmem:[%s2285_s0 + $0x1a0] ss:$16 sps:$4 sm:$0xff]   ;;  %v1714_v17 = vld [vmem:[%s2285_s0 + $0x188] ss:$16 sps:$4 sm:$0xff]   ;;  %v1721_v18 = vld [vmem:[%s2285_s0 + $0x1c4] ss:$16 sps:$4 sm:$0xff]  }
  0x52   :  { %v1718_v19 = vld [vmem:[%s2285_s0 + $0x1ac] ss:$16 sps:$4 sm:$0xff]   ;;  %v1723_v20 = vld [vmem:[%s2285_s0 + $0x1c0] ss:$16 sps:$4 sm:$0xff]   ;;  %v1720_v21 = vld [vmem:[%s2285_s0 + $0x1a8] ss:$16 sps:$4 sm:$0xff]  }
  0x53   :  { %729 = vmatmul.mubr.bf16.gmra.mrb[24].mxu0 %v1675_v52  ;;  %v1727_v22 = vld [vmem:[%s2285_s0 + $0x1e4] ss:$16 sps:$4 sm:$0xff]   ;;  %v1724_v23 = vld [vmem:[%s2285_s0 + $0x1cc] ss:$16 sps:$4 sm:$0xff]   ;;  %v1729_v24 = vld [vmem:[%s2285_s0 + $0x1e0] ss:$16 sps:$4 sm:$0xff]  }
  0x54   :  { %736 = vmatprep.mubr.bf16.mxu0 %v1679_v54  ;;  %v1726_v25 = vld [vmem:[%s2285_s0 + $0x1c8] ss:$16 sps:$4 sm:$0xff]   ;;  %v1730_v26 = vld [vmem:[%s2285_s0 + $0x1ec] ss:$16 sps:$4 sm:$0xff]   ;;  %vm1098_vm1 = vcmask 257024   ;;  %vm1131_vm2 = vcmask 261120  }
  0x55   :  { %882 = vmatmul.mubr.bf16.gmra.mrb[20].mxu1 %v1672_v53  ;;  %v1732_v27 = vld [vmem:[%s2285_s0 + $0x1e8] ss:$16 sps:$4 sm:$0xff]   ;;  %vm1202_vm3 = vcmask 253952   ;;  %s1759_s5 = smov [#allocation2]  }
  0x56   :  { %1421 = vmatprep.mubr.msk.bf16.mxu1 %vm599_vm0, %v1676_v55  ;;  %s1314_s6 = sshll.u32 %s1759_s5, 4  ;;  %s1315_s6 = int_to_ptr.vmem [resolvable:$true] %s1314_s6 }
  0x57   :  { %p1738_p1 = scmp.lt.s32.totalorder %s1315_s6, %s1315_s6 }
  0x5b   :  { %737 = vmatmul.mubr.bf16.gmra.mrb[28].mxu0 %v1681_v56 }
  0x5c   :  { %744 = vmatprep.mubr.bf16.mxu0 %v1685_v58 }
  0x5d   :  { %890 = vmatmul.mubr.bf16.gmra.mrb[24].mxu1 %v1678_v57 }
  0x5e   :  { %1422 = vmatprep.mubr.msk.bf16.mxu1 %vm599_vm0, %v1682_v59 }
  0x63   :  { %745 = vmatmul.mubr.bf16.gmra.mrb[32].mxu0 %v1687_v60 }
  0x64   :  { %752 = vmatprep.mubr.bf16.mxu0 %v1691_v62 }
  0x65   :  { %898 = vmatmul.mubr.bf16.gmra.mrb[28].mxu1 %v1684_v61 }
  0x66   :  { %1423 = vmatprep.mubr.msk.bf16.mxu1 %vm599_vm0, %v1688_v63  ;;  %v1758_v63 = vmov 0.0  }
  0x67   :  { %1132 = vst.msk [vmem:[#allocation2] sm:$0xff] %vm1131_vm2, %v1758_v63 }
  0x6b   :  { %753 = vmatmul.mubr.bf16.gmra.mrb[36].mxu0 %v1693_v0 }
  0x6c   :  { %760 = vmatprep.mubr.bf16.mxu0 %v1697_v2 }
  0x6d   :  { %906 = vmatmul.mubr.bf16.gmra.mrb[32].mxu1 %v1690_v1 }
  0x6e   :  { %1424 = vmatprep.mubr.msk.bf16.mxu1 %vm599_vm0, %v1694_v3 }
  0x73   :  { %761 = vmatmul.mubr.bf16.gmra.mrb[40].mxu0 %v1699_v4 }
  0x74   :  { %768 = vmatprep.mubr.bf16.mxu0 %v1703_v6 }
  0x75   :  { %914 = vmatmul.mubr.bf16.gmra.mrb[36].mxu1 %v1696_v5 }
  0x76   :  { %1425 = vmatprep.mubr.msk.bf16.mxu1 %vm599_vm0, %v1700_v7 }
  0x7b   :  { %769 = vmatmul.mubr.bf16.gmra.mrb[44].mxu0 %v1705_v8 }
  0x7c   :  { %776 = vmatprep.mubr.bf16.mxu0 %v1709_v10 }
  0x7d   :  { %922 = vmatmul.mubr.bf16.gmra.mrb[40].mxu1 %v1702_v9 }
  0x7e   :  { %1426 = vmatprep.mubr.msk.bf16.mxu1 %vm599_vm0, %v1706_v11 }
  0x83   :  { %777 = vmatmul.mubr.bf16.gmra.mrb[48].mxu0 %v1711_v12 }
  0x84   :  { %784 = vmatprep.mubr.bf16.mxu0 %v1715_v14 }
  0x85   :  { %930 = vmatmul.mubr.bf16.gmra.mrb[44].mxu1 %v1708_v13 }
  0x86   :  { %1427 = vmatprep.mubr.msk.bf16.mxu1 %vm599_vm0, %v1712_v15 }
  0x8b   :  { %785 = vmatmul.mubr.bf16.gmra.mrb[52].mxu0 %v1717_v16 }
  0x8c   :  { %792 = vmatprep.mubr.bf16.mxu0 %v1721_v18 }
  0x8d   :  { %938 = vmatmul.mubr.bf16.gmra.mrb[48].mxu1 %v1714_v17 }
  0x8e   :  { %1428 = vmatprep.mubr.msk.bf16.mxu1 %vm599_vm0, %v1718_v19 }
  0x93   :  { %793 = vmatmul.mubr.bf16.gmra.mrb[56].mxu0 %v1723_v20 }
  0x94   :  { %800 = vmatprep.mubr.bf16.mxu0 %v1727_v22 }
  0x95   :  { %946 = vmatmul.mubr.bf16.gmra.mrb[52].mxu1 %v1720_v21 }
  0x96   :  { %1429 = vmatprep.mubr.msk.bf16.mxu1 %vm599_vm0, %v1724_v23 }
  0x9b   :  { %801 = vmatmul.mubr.bf16.gmra.mrb[60].mxu0 %v1729_v24 }
  0x9d   :  { %954 = vmatmul.mubr.bf16.gmra.mrb[56].mxu1 %v1726_v25 }
  0x9e   :  { %1430 = vmatprep.mubr.msk.bf16.mxu1 %vm599_vm0, %v1730_v26 }
  0xa5   :  { %962 = vmatmul.mubr.bf16.gmra.mrb[60].mxu1 %v1732_v27 }
  0xf6   :  { %v1511_v28 = vpop.f32.mrb[0].mxu0 }
  0xf7   :  { %v1512_v29 = vpop.f32.mrb[1].mxu0 }
  0xf8   :  { %v1513_v30 = vadd.f32 %v1512_v29, %v1511_v28  ;;  %v1514_v31 = vpop.f32.mrb[2].mxu0 }
  0xf9   :  { %v1515_v32 = vpop.f32.mrb[3].mxu0 }
  0xfa   :  { %v1516_v33 = vadd.f32 %v1515_v32, %v1514_v31 }
  0xfe   :  { %v1517_v34 = vpop.f32.mrb[4].mxu0 }
  0xff   :  { %v1518_v36 = vpop.f32.mrb[5].mxu0 }
 0x100   :  { %v843_v35 = vpop.f32.mrb[0].mxu1  ;;  %v1519_v39 = vadd.f32 %v1518_v36, %v1517_v34  ;;  %v1520_v40 = vpop.f32.mrb[6].mxu0 }
 0x101   :  { %v844_v37 = vadd.f32 %v1513_v30, %v843_v35  ;;  %v845_v38 = vpop.f32.mrb[1].mxu1  ;;  %v1521_v42 = vpop.f32.mrb[7].mxu0 }
 0x102   :  { %v846_v41 = vpop.f32.mrb[2].mxu1  ;;  %v1522_v47 = vadd.f32 %v1521_v42, %v1520_v40 }
 0x103   :  { %v1463_v43 = vpack.c.bf16 %v844_v37, %v844_v37  ;;  %v1204_v44 = vmul.f32 %v844_v37, %v844_v37  ;;  %v847_v45 = vadd.f32 %v1516_v33, %v846_v41  ;;  %v848_v46 = vpop.f32.mrb[3].mxu1  ;;  %v1133_v48 = vsel %vm1131_vm2, %v844_v37, 0.0 }
 0x105   :  { %1099 = vst.msk [vmem:[%s2287_s2] sm:$0xf] %vm1098_vm1, %v1463_v43  ;;  %v1464_v49 = vpack.c.bf16 %v847_v45, %v847_v45  ;;  %v1134_v50 = vsel %vm1131_vm2, %v847_v45, 0.0  ;;  %v1205_v51 = vmul.f32 %v847_v45, %v847_v45  ;;  %v1236_v53 = vsel %vm1131_vm2, %v1204_v44, 0.0 }
 0x106   :  { %v1135_v52 = vadd.f32 %v1134_v50, %v1133_v48  ;;  %v1523_v55 = vpop.f32.mrb[8].mxu0 }
 0x107   :  { %1100 = vst.msk [vmem:[%s2287_s2 + $0x4] sm:$0xf] %vm1098_vm1, %v1464_v49  ;;  %v1237_v54 = vsel %vm1131_vm2, %v1205_v51, 0.0  ;;  %v1524_v58 = vpop.f32.mrb[9].mxu0 }
 0x108   :  { %v1238_v56 = vadd.f32 %v1237_v54, %v1236_v53  ;;  %v851_v57 = vpop.f32.mrb[4].mxu1  ;;  %v1525_v61 = vadd.f32 %v1524_v58, %v1523_v55  ;;  %v1526_v62 = vpop.f32.mrb[10].mxu0 }
 0x109   :  { %v852_v59 = vadd.f32 %v1519_v39, %v851_v57  ;;  %v853_v60 = vpop.f32.mrb[5].mxu1  ;;  %v1527_v1 = vpop.f32.mrb[11].mxu0 }
 0x10a   :  { %v854_v0 = vpop.f32.mrb[6].mxu1  ;;  %v1528_v8 = vadd.f32 %v1527_v1, %v1526_v62 }
 0x10b   :  { %v1465_v2 = vpack.c.bf16 %v852_v59, %v852_v59  ;;  %v1136_v3 = vsel %vm1131_vm2, %v852_v59, 0.0  ;;  %v1206_v4 = vmul.f32 %v852_v59, %v852_v59  ;;  %v855_v5 = vadd.f32 %v1522_v47, %v854_v0  ;;  %v856_v6 = vpop.f32.mrb[7].mxu1 }
 0x10c   :  { %v1137_v7 = vadd.f32 %v1136_v3, %v1135_v52 }
 0x10d   :  { %1101 = vst.msk [vmem:[%s2287_s2 + $0x8] sm:$0xf] %vm1098_vm1, %v1465_v2  ;;  %v1239_v9 = vsel %vm1131_vm2, %v1206_v4, 0.0  ;;  %v1466_v10 = vpack.c.bf16 %v855_v5, %v855_v5  ;;  %v1138_v11 = vsel %vm1131_vm2, %v855_v5, 0.0  ;;  %v1207_v12 = vmul.f32 %v855_v5, %v855_v5 }
 0x10e   :  { %v1240_v13 = vadd.f32 %v1239_v9, %v1238_v56  ;;  %v1139_v14 = vadd.f32 %v1138_v11, %v1137_v7  ;;  %v1529_v16 = vpop.f32.mrb[12].mxu0 }
 0x10f   :  { %1102 = vst.msk [vmem:[%s2287_s2 + $0xc] sm:$0xf] %vm1098_vm1, %v1466_v10  ;;  %v1241_v15 = vsel %vm1131_vm2, %v1207_v12, 0.0  ;;  %v1530_v19 = vpop.f32.mrb[13].mxu0 }
 0x110   :  { %v1242_v17 = vadd.f32 %v1241_v15, %v1240_v13  ;;  %v859_v18 = vpop.f32.mrb[8].mxu1  ;;  %v1531_v22 = vadd.f32 %v1530_v19, %v1529_v16  ;;  %v1532_v23 = vpop.f32.mrb[14].mxu0 }
 0x111   :  { %v860_v20 = vadd.f32 %v1525_v61, %v859_v18  ;;  %v861_v21 = vpop.f32.mrb[9].mxu1  ;;  %v1533_v25 = vpop.f32.mrb[15].mxu0 }
 0x112   :  { %v862_v24 = vpop.f32.mrb[10].mxu1  ;;  %v1534_v32 = vadd.f32 %v1533_v25, %v1532_v23 }
 0x113   :  { %v1467_v26 = vpack.c.bf16 %v860_v20, %v860_v20  ;;  %v1140_v27 = vsel %vm1131_vm2, %v860_v20, 0.0  ;;  %v1208_v28 = vmul.f32 %v860_v20, %v860_v20  ;;  %v863_v29 = vadd.f32 %v1528_v8, %v862_v24  ;;  %v864_v30 = vpop.f32.mrb[11].mxu1 }
 0x114   :  { %v1141_v31 = vadd.f32 %v1140_v27, %v1139_v14 }
 0x115   :  { %1103 = vst.msk [vmem:[%s2287_s2 + $0x10] sm:$0xf] %vm1098_vm1, %v1467_v26  ;;  %v1243_v33 = vsel %vm1131_vm2, %v1208_v28, 0.0  ;;  %v1468_v34 = vpack.c.bf16 %v863_v29, %v863_v29  ;;  %v1142_v35 = vsel %vm1131_vm2, %v863_v29, 0.0  ;;  %v1209_v36 = vmul.f32 %v863_v29, %v863_v29 }
 0x116   :  { %v1244_v37 = vadd.f32 %v1243_v33, %v1242_v17  ;;  %v1143_v38 = vadd.f32 %v1142_v35, %v1141_v31  ;;  %v1535_v40 = vpop.f32.mrb[16].mxu0 }
 0x117   :  { %1104 = vst.msk [vmem:[%s2287_s2 + $0x14] sm:$0xf] %vm1098_vm1, %v1468_v34  ;;  %v1245_v39 = vsel %vm1131_vm2, %v1209_v36, 0.0  ;;  %v1536_v43 = vpop.f32.mrb[17].mxu0 }
 0x118   :  { %v1246_v41 = vadd.f32 %v1245_v39, %v1244_v37  ;;  %v867_v42 = vpop.f32.mrb[12].mxu1  ;;  %v1537_v46 = vadd.f32 %v1536_v43, %v1535_v40  ;;  %v1538_v47 = vpop.f32.mrb[18].mxu0 }
 0x119   :  { %v868_v44 = vadd.f32 %v1531_v22, %v867_v42  ;;  %v869_v45 = vpop.f32.mrb[13].mxu1  ;;  %v1539_v49 = vpop.f32.mrb[19].mxu0 }
 0x11a   :  { %v870_v48 = vpop.f32.mrb[14].mxu1  ;;  %v1540_v56 = vadd.f32 %v1539_v49, %v1538_v47 }
 0x11b   :  { %v1469_v50 = vpack.c.bf16 %v868_v44, %v868_v44  ;;  %v1144_v51 = vsel %vm1131_vm2, %v868_v44, 0.0  ;;  %v1210_v52 = vmul.f32 %v868_v44, %v868_v44  ;;  %v871_v53 = vadd.f32 %v1534_v32, %v870_v48  ;;  %v872_v54 = vpop.f32.mrb[15].mxu1 }
 0x11c   :  { %v1145_v55 = vadd.f32 %v1144_v51, %v1143_v38 }
 0x11d   :  { %1105 = vst.msk [vmem:[%s2287_s2 + $0x18] sm:$0xf] %vm1098_vm1, %v1469_v50  ;;  %v1247_v57 = vsel %vm1131_vm2, %v1210_v52, 0.0  ;;  %v1470_v58 = vpack.c.bf16 %v871_v53, %v871_v53  ;;  %v1146_v59 = vsel %vm1131_vm2, %v871_v53, 0.0  ;;  %v1211_v60 = vmul.f32 %v871_v53, %v871_v53 }
 0x11e   :  { %v1248_v61 = vadd.f32 %v1247_v57, %v1246_v41  ;;  %v1147_v62 = vadd.f32 %v1146_v59, %v1145_v55  ;;  %v1541_v0 = vpop.f32.mrb[20].mxu0 }
 0x11f   :  { %1106 = vst.msk [vmem:[%s2287_s2 + $0x1c] sm:$0xf] %vm1098_vm1, %v1470_v58  ;;  %v1249_v63 = vsel %vm1131_vm2, %v1211_v60, 0.0  ;;  %v1542_v3 = vpop.f32.mrb[21].mxu0 }
 0x120   :  { %v1250_v1 = vadd.f32 %v1249_v63, %v1248_v61  ;;  %v875_v2 = vpop.f32.mrb[16].mxu1  ;;  %v1543_v6 = vadd.f32 %v1542_v3, %v1541_v0  ;;  %v1544_v7 = vpop.f32.mrb[22].mxu0 }
 0x121   :  { %v876_v4 = vadd.f32 %v1537_v46, %v875_v2  ;;  %v877_v5 = vpop.f32.mrb[17].mxu1  ;;  %v1545_v9 = vpop.f32.mrb[23].mxu0 }
 0x122   :  { %v878_v8 = vpop.f32.mrb[18].mxu1  ;;  %v1546_v16 = vadd.f32 %v1545_v9, %v1544_v7 }
 0x123   :  { %v1471_v10 = vpack.c.bf16 %v876_v4, %v876_v4  ;;  %v1148_v11 = vsel %vm1131_vm2, %v876_v4, 0.0  ;;  %v1212_v12 = vmul.f32 %v876_v4, %v876_v4  ;;  %v879_v13 = vadd.f32 %v1540_v56, %v878_v8  ;;  %v880_v14 = vpop.f32.mrb[19].mxu1 }
 0x124   :  { %v1149_v15 = vadd.f32 %v1148_v11, %v1147_v62 }
 0x125   :  { %1107 = vst.msk [vmem:[%s2287_s2 + $0x20] sm:$0xf] %vm1098_vm1, %v1471_v10  ;;  %v1251_v17 = vsel %vm1131_vm2, %v1212_v12, 0.0  ;;  %v1472_v18 = vpack.c.bf16 %v879_v13, %v879_v13  ;;  %v1150_v19 = vsel %vm1131_vm2, %v879_v13, 0.0  ;;  %v1213_v20 = vmul.f32 %v879_v13, %v879_v13 }
 0x126   :  { %v1252_v21 = vadd.f32 %v1251_v17, %v1250_v1  ;;  %v1151_v22 = vadd.f32 %v1150_v19, %v1149_v15  ;;  %v1547_v24 = vpop.f32.mrb[24].mxu0 }
 0x127   :  { %1108 = vst.msk [vmem:[%s2287_s2 + $0x24] sm:$0xf] %vm1098_vm1, %v1472_v18  ;;  %v1253_v23 = vsel %vm1131_vm2, %v1213_v20, 0.0  ;;  %v1548_v27 = vpop.f32.mrb[25].mxu0 }
 0x128   :  { %v1254_v25 = vadd.f32 %v1253_v23, %v1252_v21  ;;  %v883_v26 = vpop.f32.mrb[20].mxu1  ;;  %v1549_v30 = vadd.f32 %v1548_v27, %v1547_v24  ;;  %v1550_v31 = vpop.f32.mrb[26].mxu0 }
 0x129   :  { %v884_v28 = vadd.f32 %v1543_v6, %v883_v26  ;;  %v885_v29 = vpop.f32.mrb[21].mxu1  ;;  %v1551_v33 = vpop.f32.mrb[27].mxu0 }
 0x12a   :  { %v886_v32 = vpop.f32.mrb[22].mxu1  ;;  %v1552_v40 = vadd.f32 %v1551_v33, %v1550_v31 }
 0x12b   :  { %v1473_v34 = vpack.c.bf16 %v884_v28, %v884_v28  ;;  %v1152_v35 = vsel %vm1131_vm2, %v884_v28, 0.0  ;;  %v1214_v36 = vmul.f32 %v884_v28, %v884_v28  ;;  %v887_v37 = vadd.f32 %v1546_v16, %v886_v32  ;;  %v888_v38 = vpop.f32.mrb[23].mxu1 }
 0x12c   :  { %v1153_v39 = vadd.f32 %v1152_v35, %v1151_v22 }
 0x12d   :  { %1109 = vst.msk [vmem:[%s2287_s2 + $0x28] sm:$0xf] %vm1098_vm1, %v1473_v34  ;;  %v1255_v41 = vsel %vm1131_vm2, %v1214_v36, 0.0  ;;  %v1474_v42 = vpack.c.bf16 %v887_v37, %v887_v37  ;;  %v1154_v43 = vsel %vm1131_vm2, %v887_v37, 0.0  ;;  %v1215_v44 = vmul.f32 %v887_v37, %v887_v37 }
 0x12e   :  { %v1256_v45 = vadd.f32 %v1255_v41, %v1254_v25  ;;  %v1155_v46 = vadd.f32 %v1154_v43, %v1153_v39  ;;  %v1553_v48 = vpop.f32.mrb[28].mxu0 }
 0x12f   :  { %1110 = vst.msk [vmem:[%s2287_s2 + $0x2c] sm:$0xf] %vm1098_vm1, %v1474_v42  ;;  %v1257_v47 = vsel %vm1131_vm2, %v1215_v44, 0.0  ;;  %v1554_v51 = vpop.f32.mrb[29].mxu0 }
 0x130   :  { %v1258_v49 = vadd.f32 %v1257_v47, %v1256_v45  ;;  %v891_v50 = vpop.f32.mrb[24].mxu1  ;;  %v1555_v54 = vadd.f32 %v1554_v51, %v1553_v48  ;;  %v1556_v55 = vpop.f32.mrb[30].mxu0 }
 0x131   :  { %v892_v52 = vadd.f32 %v1549_v30, %v891_v50  ;;  %v893_v53 = vpop.f32.mrb[25].mxu1  ;;  %v1557_v57 = vpop.f32.mrb[31].mxu0 }
 0x132   :  { %v894_v56 = vpop.f32.mrb[26].mxu1  ;;  %v1558_v0 = vadd.f32 %v1557_v57, %v1556_v55 }
 0x133   :  { %v1475_v58 = vpack.c.bf16 %v892_v52, %v892_v52  ;;  %v1156_v59 = vsel %vm1131_vm2, %v892_v52, 0.0  ;;  %v1216_v60 = vmul.f32 %v892_v52, %v892_v52  ;;  %v895_v61 = vadd.f32 %v1552_v40, %v894_v56  ;;  %v896_v62 = vpop.f32.mrb[27].mxu1 }
 0x134   :  { %v1157_v63 = vadd.f32 %v1156_v59, %v1155_v46 }
 0x135   :  { %1111 = vst.msk [vmem:[%s2287_s2 + $0x30] sm:$0xf] %vm1098_vm1, %v1475_v58  ;;  %v1259_v1 = vsel %vm1131_vm2, %v1216_v60, 0.0  ;;  %v1476_v2 = vpack.c.bf16 %v895_v61, %v895_v61  ;;  %v1158_v3 = vsel %vm1131_vm2, %v895_v61, 0.0  ;;  %v1217_v4 = vmul.f32 %v895_v61, %v895_v61 }
 0x136   :  { %v1260_v5 = vadd.f32 %v1259_v1, %v1258_v49  ;;  %v1159_v6 = vadd.f32 %v1158_v3, %v1157_v63  ;;  %v1559_v8 = vpop.f32.mrb[32].mxu0 }
 0x137   :  { %1112 = vst.msk [vmem:[%s2287_s2 + $0x34] sm:$0xf] %vm1098_vm1, %v1476_v2  ;;  %v1261_v7 = vsel %vm1131_vm2, %v1217_v4, 0.0  ;;  %v1560_v11 = vpop.f32.mrb[33].mxu0 }
 0x138   :  { %v1262_v9 = vadd.f32 %v1261_v7, %v1260_v5  ;;  %v899_v10 = vpop.f32.mrb[28].mxu1  ;;  %v1561_v14 = vadd.f32 %v1560_v11, %v1559_v8  ;;  %v1562_v15 = vpop.f32.mrb[34].mxu0 }
 0x139   :  { %v900_v12 = vadd.f32 %v1555_v54, %v899_v10  ;;  %v901_v13 = vpop.f32.mrb[29].mxu1  ;;  %v1563_v17 = vpop.f32.mrb[35].mxu0 }
 0x13a   :  { %v902_v16 = vpop.f32.mrb[30].mxu1  ;;  %v1564_v24 = vadd.f32 %v1563_v17, %v1562_v15 }
 0x13b   :  { %v1477_v18 = vpack.c.bf16 %v900_v12, %v900_v12  ;;  %v1160_v19 = vsel %vm1131_vm2, %v900_v12, 0.0  ;;  %v1218_v20 = vmul.f32 %v900_v12, %v900_v12  ;;  %v903_v21 = vadd.f32 %v1558_v0, %v902_v16  ;;  %v904_v22 = vpop.f32.mrb[31].mxu1 }
 0x13c   :  { %v1161_v23 = vadd.f32 %v1160_v19, %v1159_v6 }
 0x13d   :  { %1113 = vst.msk [vmem:[%s2287_s2 + $0x38] sm:$0xf] %vm1098_vm1, %v1477_v18  ;;  %v1263_v25 = vsel %vm1131_vm2, %v1218_v20, 0.0  ;;  %v1478_v26 = vpack.c.bf16 %v903_v21, %v903_v21  ;;  %v1162_v27 = vsel %vm1131_vm2, %v903_v21, 0.0  ;;  %v1219_v28 = vmul.f32 %v903_v21, %v903_v21 }
 0x13e   :  { %v1264_v29 = vadd.f32 %v1263_v25, %v1262_v9  ;;  %v1163_v30 = vadd.f32 %v1162_v27, %v1161_v23  ;;  %v1565_v32 = vpop.f32.mrb[36].mxu0 }
 0x13f   :  { %1114 = vst.msk [vmem:[%s2287_s2 + $0x3c] sm:$0xf] %vm1098_vm1, %v1478_v26  ;;  %v1265_v31 = vsel %vm1131_vm2, %v1219_v28, 0.0  ;;  %v1566_v35 = vpop.f32.mrb[37].mxu0 }
 0x140   :  { %v1266_v33 = vadd.f32 %v1265_v31, %v1264_v29  ;;  %v907_v34 = vpop.f32.mrb[32].mxu1  ;;  %v1567_v38 = vadd.f32 %v1566_v35, %v1565_v32  ;;  %v1568_v39 = vpop.f32.mrb[38].mxu0 }
 0x141   :  { %v908_v36 = vadd.f32 %v1561_v14, %v907_v34  ;;  %v909_v37 = vpop.f32.mrb[33].mxu1  ;;  %v1569_v41 = vpop.f32.mrb[39].mxu0 }
 0x142   :  { %v910_v40 = vpop.f32.mrb[34].mxu1  ;;  %v1570_v48 = vadd.f32 %v1569_v41, %v1568_v39 }
 0x143   :  { %v1479_v42 = vpack.c.bf16 %v908_v36, %v908_v36  ;;  %v1164_v43 = vsel %vm1131_vm2, %v908_v36, 0.0  ;;  %v1220_v44 = vmul.f32 %v908_v36, %v908_v36  ;;  %v911_v45 = vadd.f32 %v1564_v24, %v910_v40  ;;  %v912_v46 = vpop.f32.mrb[35].mxu1 }
 0x144   :  { %v1165_v47 = vadd.f32 %v1164_v43, %v1163_v30 }
 0x145   :  { %1115 = vst.msk [vmem:[%s2287_s2 + $0x40] sm:$0xf] %vm1098_vm1, %v1479_v42  ;;  %v1267_v49 = vsel %vm1131_vm2, %v1220_v44, 0.0  ;;  %v1480_v50 = vpack.c.bf16 %v911_v45, %v911_v45  ;;  %v1166_v51 = vsel %vm1131_vm2, %v911_v45, 0.0  ;;  %v1221_v52 = vmul.f32 %v911_v45, %v911_v45 }
 0x146   :  { %v1268_v53 = vadd.f32 %v1267_v49, %v1266_v33  ;;  %v1167_v54 = vadd.f32 %v1166_v51, %v1165_v47  ;;  %v1571_v56 = vpop.f32.mrb[40].mxu0 }
 0x147   :  { %1116 = vst.msk [vmem:[%s2287_s2 + $0x44] sm:$0xf] %vm1098_vm1, %v1480_v50  ;;  %v1269_v55 = vsel %vm1131_vm2, %v1221_v52, 0.0  ;;  %v1572_v59 = vpop.f32.mrb[41].mxu0 }
 0x148   :  { %v1270_v57 = vadd.f32 %v1269_v55, %v1268_v53  ;;  %v915_v58 = vpop.f32.mrb[36].mxu1  ;;  %v1573_v62 = vadd.f32 %v1572_v59, %v1571_v56  ;;  %v1574_v63 = vpop.f32.mrb[42].mxu0 }
 0x149   :  { %v916_v60 = vadd.f32 %v1567_v38, %v915_v58  ;;  %v917_v61 = vpop.f32.mrb[37].mxu1  ;;  %v1575_v1 = vpop.f32.mrb[43].mxu0 }
 0x14a   :  { %v918_v0 = vpop.f32.mrb[38].mxu1  ;;  %v1576_v8 = vadd.f32 %v1575_v1, %v1574_v63 }
 0x14b   :  { %v1481_v2 = vpack.c.bf16 %v916_v60, %v916_v60  ;;  %v1168_v3 = vsel %vm1131_vm2, %v916_v60, 0.0  ;;  %v1222_v4 = vmul.f32 %v916_v60, %v916_v60  ;;  %v919_v5 = vadd.f32 %v1570_v48, %v918_v0  ;;  %v920_v6 = vpop.f32.mrb[39].mxu1 }
 0x14c   :  { %v1169_v7 = vadd.f32 %v1168_v3, %v1167_v54 }
 0x14d   :  { %1117 = vst.msk [vmem:[%s2287_s2 + $0x48] sm:$0xf] %vm1098_vm1, %v1481_v2  ;;  %v1271_v9 = vsel %vm1131_vm2, %v1222_v4, 0.0  ;;  %v1482_v10 = vpack.c.bf16 %v919_v5, %v919_v5  ;;  %v1170_v11 = vsel %vm1131_vm2, %v919_v5, 0.0  ;;  %v1223_v12 = vmul.f32 %v919_v5, %v919_v5 }
 0x14e   :  { %v1272_v13 = vadd.f32 %v1271_v9, %v1270_v57  ;;  %v1171_v14 = vadd.f32 %v1170_v11, %v1169_v7  ;;  %v1577_v16 = vpop.f32.mrb[44].mxu0 }
 0x14f   :  { %1118 = vst.msk [vmem:[%s2287_s2 + $0x4c] sm:$0xf] %vm1098_vm1, %v1482_v10  ;;  %v1273_v15 = vsel %vm1131_vm2, %v1223_v12, 0.0  ;;  %v1578_v19 = vpop.f32.mrb[45].mxu0 }
 0x150   :  { %v1274_v17 = vadd.f32 %v1273_v15, %v1272_v13  ;;  %v923_v18 = vpop.f32.mrb[40].mxu1  ;;  %v1579_v22 = vadd.f32 %v1578_v19, %v1577_v16  ;;  %v1580_v23 = vpop.f32.mrb[46].mxu0 }
 0x151   :  { %v924_v20 = vadd.f32 %v1573_v62, %v923_v18  ;;  %v925_v21 = vpop.f32.mrb[41].mxu1  ;;  %v1581_v25 = vpop.f32.mrb[47].mxu0 }
 0x152   :  { %v926_v24 = vpop.f32.mrb[42].mxu1  ;;  %v1582_v32 = vadd.f32 %v1581_v25, %v1580_v23 }
 0x153   :  { %v1483_v26 = vpack.c.bf16 %v924_v20, %v924_v20  ;;  %v1172_v27 = vsel %vm1131_vm2, %v924_v20, 0.0  ;;  %v1224_v28 = vmul.f32 %v924_v20, %v924_v20  ;;  %v927_v29 = vadd.f32 %v1576_v8, %v926_v24  ;;  %v928_v30 = vpop.f32.mrb[43].mxu1 }
 0x154   :  { %v1173_v31 = vadd.f32 %v1172_v27, %v1171_v14 }
 0x155   :  { %1119 = vst.msk [vmem:[%s2287_s2 + $0x50] sm:$0xf] %vm1098_vm1, %v1483_v26  ;;  %v1275_v33 = vsel %vm1131_vm2, %v1224_v28, 0.0  ;;  %v1484_v34 = vpack.c.bf16 %v927_v29, %v927_v29  ;;  %v1174_v35 = vsel %vm1131_vm2, %v927_v29, 0.0  ;;  %v1225_v36 = vmul.f32 %v927_v29, %v927_v29 }
 0x156   :  { %v1276_v37 = vadd.f32 %v1275_v33, %v1274_v17  ;;  %v1175_v38 = vadd.f32 %v1174_v35, %v1173_v31  ;;  %v1583_v40 = vpop.f32.mrb[48].mxu0 }
 0x157   :  { %1120 = vst.msk [vmem:[%s2287_s2 + $0x54] sm:$0xf] %vm1098_vm1, %v1484_v34  ;;  %v1277_v39 = vsel %vm1131_vm2, %v1225_v36, 0.0  ;;  %v1584_v43 = vpop.f32.mrb[49].mxu0 }
 0x158   :  { %v1278_v41 = vadd.f32 %v1277_v39, %v1276_v37  ;;  %v931_v42 = vpop.f32.mrb[44].mxu1  ;;  %v1585_v46 = vadd.f32 %v1584_v43, %v1583_v40  ;;  %v1586_v47 = vpop.f32.mrb[50].mxu0 }
 0x159   :  { %v932_v44 = vadd.f32 %v1579_v22, %v931_v42  ;;  %v933_v45 = vpop.f32.mrb[45].mxu1  ;;  %v1587_v49 = vpop.f32.mrb[51].mxu0 }
 0x15a   :  { %v934_v48 = vpop.f32.mrb[46].mxu1  ;;  %v1588_v56 = vadd.f32 %v1587_v49, %v1586_v47 }
 0x15b   :  { %v1485_v50 = vpack.c.bf16 %v932_v44, %v932_v44  ;;  %v1176_v51 = vsel %vm1131_vm2, %v932_v44, 0.0  ;;  %v1226_v52 = vmul.f32 %v932_v44, %v932_v44  ;;  %v935_v53 = vadd.f32 %v1582_v32, %v934_v48  ;;  %v936_v54 = vpop.f32.mrb[47].mxu1 }
 0x15c   :  { %v1177_v55 = vadd.f32 %v1176_v51, %v1175_v38 }
 0x15d   :  { %1121 = vst.msk [vmem:[%s2287_s2 + $0x58] sm:$0xf] %vm1098_vm1, %v1485_v50  ;;  %v1279_v57 = vsel %vm1131_vm2, %v1226_v52, 0.0  ;;  %v1486_v58 = vpack.c.bf16 %v935_v53, %v935_v53  ;;  %v1178_v59 = vsel %vm1131_vm2, %v935_v53, 0.0  ;;  %v1227_v60 = vmul.f32 %v935_v53, %v935_v53 }
 0x15e   :  { %v1280_v61 = vadd.f32 %v1279_v57, %v1278_v41  ;;  %v1179_v62 = vadd.f32 %v1178_v59, %v1177_v55  ;;  %v1589_v0 = vpop.f32.mrb[52].mxu0 }
 0x15f   :  { %1122 = vst.msk [vmem:[%s2287_s2 + $0x5c] sm:$0xf] %vm1098_vm1, %v1486_v58  ;;  %v1281_v63 = vsel %vm1131_vm2, %v1227_v60, 0.0  ;;  %v1590_v3 = vpop.f32.mrb[53].mxu0 }
 0x160   :  { %v1282_v1 = vadd.f32 %v1281_v63, %v1280_v61  ;;  %v939_v2 = vpop.f32.mrb[48].mxu1  ;;  %v1591_v6 = vadd.f32 %v1590_v3, %v1589_v0  ;;  %v1592_v7 = vpop.f32.mrb[54].mxu0 }
 0x161   :  { %v940_v4 = vadd.f32 %v1585_v46, %v939_v2  ;;  %v941_v5 = vpop.f32.mrb[49].mxu1  ;;  %v1593_v9 = vpop.f32.mrb[55].mxu0 }
 0x162   :  { %v942_v8 = vpop.f32.mrb[50].mxu1  ;;  %v1594_v16 = vadd.f32 %v1593_v9, %v1592_v7 }
 0x163   :  { %v1487_v10 = vpack.c.bf16 %v940_v4, %v940_v4  ;;  %v1180_v11 = vsel %vm1131_vm2, %v940_v4, 0.0  ;;  %v1228_v12 = vmul.f32 %v940_v4, %v940_v4  ;;  %v943_v13 = vadd.f32 %v1588_v56, %v942_v8  ;;  %v944_v14 = vpop.f32.mrb[51].mxu1 }
 0x164   :  { %v1181_v15 = vadd.f32 %v1180_v11, %v1179_v62 }
 0x165   :  { %1123 = vst.msk [vmem:[%s2287_s2 + $0x60] sm:$0xf] %vm1098_vm1, %v1487_v10  ;;  %v1283_v17 = vsel %vm1131_vm2, %v1228_v12, 0.0  ;;  %v1488_v18 = vpack.c.bf16 %v943_v13, %v943_v13  ;;  %v1182_v19 = vsel %vm1131_vm2, %v943_v13, 0.0  ;;  %v1229_v20 = vmul.f32 %v943_v13, %v943_v13 }
 0x166   :  { %v1284_v21 = vadd.f32 %v1283_v17, %v1282_v1  ;;  %v1183_v22 = vadd.f32 %v1182_v19, %v1181_v15  ;;  %v1595_v24 = vpop.f32.mrb[56].mxu0 }
 0x167   :  { %1124 = vst.msk [vmem:[%s2287_s2 + $0x64] sm:$0xf] %vm1098_vm1, %v1488_v18  ;;  %v1285_v23 = vsel %vm1131_vm2, %v1229_v20, 0.0  ;;  %v1596_v27 = vpop.f32.mrb[57].mxu0 }
 0x168   :  { %v1286_v25 = vadd.f32 %v1285_v23, %v1284_v21  ;;  %v947_v26 = vpop.f32.mrb[52].mxu1  ;;  %v1597_v30 = vadd.f32 %v1596_v27, %v1595_v24  ;;  %v1598_v31 = vpop.f32.mrb[58].mxu0 }
 0x169   :  { %v948_v28 = vadd.f32 %v1591_v6, %v947_v26  ;;  %v949_v29 = vpop.f32.mrb[53].mxu1  ;;  %v1599_v33 = vpop.f32.mrb[59].mxu0 }
 0x16a   :  { %v950_v32 = vpop.f32.mrb[54].mxu1  ;;  %v1600_v40 = vadd.f32 %v1599_v33, %v1598_v31 }
 0x16b   :  { %v1489_v34 = vpack.c.bf16 %v948_v28, %v948_v28  ;;  %v1184_v35 = vsel %vm1131_vm2, %v948_v28, 0.0  ;;  %v1230_v36 = vmul.f32 %v948_v28, %v948_v28  ;;  %v951_v37 = vadd.f32 %v1594_v16, %v950_v32  ;;  %v952_v38 = vpop.f32.mrb[55].mxu1 }
 0x16c   :  { %v1185_v39 = vadd.f32 %v1184_v35, %v1183_v22 }
 0x16d   :  { %1125 = vst.msk [vmem:[%s2287_s2 + $0x68] sm:$0xf] %vm1098_vm1, %v1489_v34  ;;  %v1287_v41 = vsel %vm1131_vm2, %v1230_v36, 0.0  ;;  %v1490_v42 = vpack.c.bf16 %v951_v37, %v951_v37  ;;  %v1186_v43 = vsel %vm1131_vm2, %v951_v37, 0.0  ;;  %v1231_v44 = vmul.f32 %v951_v37, %v951_v37 }
 0x16e   :  { %v1288_v45 = vadd.f32 %v1287_v41, %v1286_v25  ;;  %v1187_v46 = vadd.f32 %v1186_v43, %v1185_v39  ;;  %v1601_v48 = vpop.f32.mrb[60].mxu0 }
 0x16f   :  { %1126 = vst.msk [vmem:[%s2287_s2 + $0x6c] sm:$0xf] %vm1098_vm1, %v1490_v42  ;;  %v1289_v47 = vsel %vm1131_vm2, %v1231_v44, 0.0  ;;  %v1602_v51 = vpop.f32.mrb[61].mxu0 }
 0x170   :  { %v1290_v49 = vadd.f32 %v1289_v47, %v1288_v45  ;;  %v955_v50 = vpop.f32.mrb[56].mxu1  ;;  %v1603_v54 = vadd.f32 %v1602_v51, %v1601_v48  ;;  %v1604_v55 = vpop.f32.mrb[62].mxu0 }
 0x171   :  { %v956_v52 = vadd.f32 %v1597_v30, %v955_v50  ;;  %v957_v53 = vpop.f32.mrb[57].mxu1  ;;  %v1605_v57 = vpop.f32.mrb[63].mxu0 }
 0x172   :  { %v958_v56 = vpop.f32.mrb[58].mxu1  ;;  %v1606_v0 = vadd.f32 %v1605_v57, %v1604_v55 }
 0x173   :  { %v1491_v58 = vpack.c.bf16 %v956_v52, %v956_v52  ;;  %v1188_v59 = vsel %vm1131_vm2, %v956_v52, 0.0  ;;  %v1232_v60 = vmul.f32 %v956_v52, %v956_v52  ;;  %v959_v61 = vadd.f32 %v1600_v40, %v958_v56  ;;  %v960_v62 = vpop.f32.mrb[59].mxu1 }
 0x174   :  { %v1189_v63 = vadd.f32 %v1188_v59, %v1187_v46 }
 0x175   :  { %1127 = vst.msk [vmem:[%s2287_s2 + $0x70] sm:$0xf] %vm1098_vm1, %v1491_v58  ;;  %v1291_v1 = vsel %vm1131_vm2, %v1232_v60, 0.0  ;;  %v1492_v2 = vpack.c.bf16 %v959_v61, %v959_v61  ;;  %v1190_v3 = vsel %vm1131_vm2, %v959_v61, 0.0  ;;  %v1233_v4 = vmul.f32 %v959_v61, %v959_v61 }
 0x176   :  { %v1292_v5 = vadd.f32 %v1291_v1, %v1290_v49  ;;  %v1191_v6 = vadd.f32 %v1190_v3, %v1189_v63 }
 0x177   :  { %1128 = vst.msk [vmem:[%s2287_s2 + $0x74] sm:$0xf] %vm1098_vm1, %v1492_v2  ;;  %v1293_v7 = vsel %vm1131_vm2, %v1233_v4, 0.0 }
 0x178   :  { %v1294_v8 = vadd.f32 %v1293_v7, %v1292_v5  ;;  %v963_v9 = vpop.f32.mrb[60].mxu1 }
 0x179   :  { %v964_v10 = vadd.f32 %v1603_v54, %v963_v9  ;;  %v965_v11 = vpop.f32.mrb[61].mxu1 }
 0x17a   :  { %v966_v12 = vpop.f32.mrb[62].mxu1 }
 0x17b   :  { %v1493_v13 = vpack.c.bf16 %v964_v10, %v964_v10  ;;  %v1192_v14 = vsel %vm1131_vm2, %v964_v10, 0.0  ;;  %v1234_v15 = vmul.f32 %v964_v10, %v964_v10  ;;  %v967_v16 = vadd.f32 %v1606_v0, %v966_v12  ;;  %v968_v17 = vpop.f32.mrb[63].mxu1 }
 0x17c   :  { %v1193_v18 = vadd.f32 %v1192_v14, %v1191_v6 }
 0x17d   :  { %1129 = vst.msk [vmem:[%s2287_s2 + $0x78] sm:$0xf] %vm1098_vm1, %v1493_v13  ;;  %v1295_v19 = vsel %vm1131_vm2, %v1234_v15, 0.0  ;;  %v1494_v20 = vpack.c.bf16 %v967_v16, %v967_v16  ;;  %v1194_v21 = vsel %vm1131_vm2, %v967_v16, 0.0  ;;  %v1235_v22 = vmul.f32 %v967_v16, %v967_v16 }
 0x17e   :  { %v1296_v23 = vadd.f32 %v1295_v19, %v1294_v8  ;;  %v1195_v24 = vadd.f32 %v1194_v21, %v1193_v18 }
 0x17f   :  { %1130 = vst.msk [vmem:[%s2287_s2 + $0x7c] sm:$0xf] %vm1098_vm1, %v1494_v20  ;;  %v1297_v25 = vsel %vm1131_vm2, %v1235_v22, 0.0  ;;  %s1733_s2 = scalar_lea.vmem %s1315_s6, 128 }
 0x180   :  { %v1196_v26 = vrot.slane %v1195_v24, 4  ;;  %v1298_v27 = vadd.f32 %v1297_v25, %v1296_v23  ;;  %p1734_p0 = scmp.ne.s32.totalorder %s1315_s6, %s1733_s2  ;;  %p1739_p2 = scmp.lt.s32.totalorder %s1733_s2, %s1733_s2 }
 0x182   :  { %v1197_v28 = vadd.f32 %v1196_v26, %v1195_v24  ;;  %v1299_v29 = vrot.slane %v1298_v27, 4  ;;  %p1740_p3 = por %p1739_p2, %p1738_p1 }
 0x184   :  { %v1198_v30 = vrot.slane %v1197_v28, 2  ;;  %v1300_v31 = vadd.f32 %v1299_v29, %v1298_v27  ;;  %p1741_p4 = pnand %p1740_p3, %p1734_p0 }
 0x186   :  { %v1199_v32 = vadd.f32 %v1198_v30, %v1197_v28  ;;  %v1301_v33 = vrot.slane %v1300_v31, 2 }
 0x188   :  { %v1200_v34 = vrot.slane %v1199_v32, 1  ;;  %v1302_v35 = vadd.f32 %v1301_v33, %v1300_v31 }
 0x18a   :  { %v1201_v36 = vadd.f32 %v1200_v34, %v1199_v32  ;;  %v1303_v37 = vrot.slane %v1302_v35, 1 }
 0x18c   :  { %1203 = vst.msk [vmem:[#allocation2] sm:$0x1] %vm1202_vm3, %v1201_v36  ;;  %v1304_v38 = vadd.f32 %v1303_v37, %v1302_v35 }
 0x18e   :  { %1305 = vst.msk [vmem:[#allocation2 + $0x1] sm:$0x1] %vm1202_vm3, %v1304_v38 }
 0x18f   :  { %1744 = shalt.err (!%p1741_p4)
}
 0x190   :  { %s1745_s9 = scalar_lea.hbm %s2288_s3, 128 }
 0x191   :  { %p1746_p5 = scmp.ne.s32.totalorder %s2288_s3, %s1745_s9  ;;  %p1749_p6 = scmp.lt.u32.totalorder %s1745_s9, %s2288_s3 }
 0x193   :  { %p1751_p7 = pnand %p1749_p6, %p1746_p5 }
 0x195   :  { %1754 = shalt.err (!%p1751_p7)
}
 0x196   :  { %1317 = dma.vmem_to_hbm [thread:$0]  %s1315_s6, 128, %s2288_s3, [#allocation3]  }
 0x197   :  { %1755 = dma.done.wait [#allocation3], 128  }
 0x198   :  { %1756 = vsyncadd [#allocation3], 4294967168 }
 0x199   :  { %1323 = vsyncpa [#allocation3], 1 }

</bundles_post_ra>
